<compile_context>
chip_gen: v5e
topology: v5e:2x2
jax: 0.10.0
libtpu: 0.0.40
codegen_flags: <defaults>
</compile_context>

<pallas_src>
import jax
import jax.numpy as jnp
from jax.experimental import pallas as pl
from jax.experimental.pallas import tpu as pltpu


def _round_up(x, m):
    return ((x + m - 1) // m) * m


def _vmem_capacity_bytes():
    try:
        info = pltpu.get_tpu_info()
        cap = getattr(info, "vmem_capacity_bytes", None)
        if cap:
            return int(cap)
    except Exception:
        pass
    return 64 << 20  # conservative fallback (v7x per-TC VMEM)


def _num_tensorcores():
    # v7x has 2 TensorCores per chip; v4/v5p present 2 TCs per device (megacore).
    try:
        kind = jax.devices()[0].device_kind.lower()
    except Exception:
        return 1
    for tag in ("v7", "v5p", "v4"):
        if tag in kind:
            return 2
    return 1


def _tile_vmem_bytes(tm, tk, emb_p, cbytes):
    return (2 * tm * emb_p * cbytes        # x row tile (double-buffered, bf16)
            + 2 * emb_p * tk * cbytes      # w1 K-chunk
            + 2 * tk * emb_p * cbytes      # w2 K-chunk
            + 2 * tm * emb_p * 4           # f32 output / accumulator tile
            + 2 * 8 * tk * 4               # b1 chunk (sublane-padded)
            + 2 * 8 * emb_p * 4)           # b2


def ffn_kernel(x_ref, w1_ref, b1_ref, w2_ref, b2_ref, o_ref):
    k = pl.program_id(1)

    # h_k = relu(x @ w1[:, k-chunk] + b1[k-chunk])  -- f32 accumulation on the MXU.
    h = jnp.dot(x_ref[...], w1_ref[...], preferred_element_type=jnp.float32)
    h = jnp.maximum(h + b1_ref[...], 0.0)
    # Dropout(p=0.0) is the identity in the forward pass.
    # TODO(synk): for dropout > 0, mask h using pltpu.prng_seed + pltpu.prng_random_bits.

    # Partial second matmul for this K-chunk (f32 accumulation).
    p = jnp.dot(h.astype(w2_ref.dtype), w2_ref[...],
                preferred_element_type=jnp.float32)

    # Accumulate directly into the resident f32 output block (no scratch); the first
    # K step writes the partial product + b2 directly (no zero-fill, no extra RMW).
    @pl.when(k == 0)
    def _():
        o_ref[...] = p + b2_ref[...]

    @pl.when(k > 0)
    def _():
        o_ref[...] += p


def feed_forward(x, w1, b1, w2, b2, *, tm=512, tk=1024,
                 compute_dtype=jnp.bfloat16):
    """Fused FFN: relu(x @ w1 + b1) @ w2 + b2.

    x : (batch, seq, emb_dim)
    w1: (emb_dim, mid_dim), b1: (mid_dim,), w2: (mid_dim, emb_dim), b2: (emb_dim,)
    (w1/w2 are already transposed relative to PyTorch's nn.Linear weight storage.)
    """
    batch, seq, emb_dim = x.shape
    mid_dim = w1.shape[1]
    rows = batch * seq
    out_dtype = x.dtype
    cbytes = jnp.dtype(compute_dtype).itemsize

    # --- padded logical dims: lane-dense emb (128) and MXU-friendly mid (256) ---
    emb_p = _round_up(emb_dim, 128)
    mid_p0 = _round_up(mid_dim, 256)

    # --- K-chunk size: multiple of 256, not exceeding the padded mid dim ---
    tk_eff = min(_round_up(tk, 256), mid_p0)
    mid_p = _round_up(mid_p0, tk_eff)

    # --- row tile ---
    tm_eff = min(tm, _round_up(rows, 8))

    # Guarantee >= num_cores row tiles so the "parallel" axis splits across TCs.
    num_cores = _num_tensorcores()
    if num_cores > 1 and rows >= num_cores * 8:
        n_row_tiles = -(-rows // tm_eff)
        if n_row_tiles < num_cores:
            tm_eff = _round_up(-(-rows // num_cores), 8)

    # --- shrink tiles (if necessary) to fit ~75% of physical VMEM ---
    vmem_cap = _vmem_capacity_bytes()
    budget = int(vmem_cap * 0.75)
    while _tile_vmem_bytes(tm_eff, tk_eff, emb_p, cbytes) > budget:
        if tk_eff > 512:
            tk_eff //= 2
        elif tm_eff > 256:
            tm_eff = _round_up(tm_eff // 2, 8)
        elif tk_eff > 256:
            tk_eff //= 2
        elif tm_eff > 8:
            tm_eff = max(8, _round_up(tm_eff // 2, 8))
        else:
            break
    mid_p = _round_up(mid_p0, tk_eff)

    # --- pad rows / mid / emb so the grid tiles evenly (all padding is exact) ---
    rows_p = _round_up(rows, tm_eff)

    x2d = x.reshape(rows, emb_dim)
    if rows_p != rows or emb_p != emb_dim:
        x2d = jnp.pad(x2d, ((0, rows_p - rows), (0, emb_p - emb_dim)))
    if emb_p != emb_dim or mid_p != mid_dim:
        # Zero-padded emb rows of w1 meet zero x columns; zero-padded hidden units give
        # relu(0 + 0) @ 0 = 0; zero-padded emb cols of w2 / b2 are sliced away -> exact.
        w1 = jnp.pad(w1, ((0, emb_p - emb_dim), (0, mid_p - mid_dim)))
        b1 = jnp.pad(b1, ((0, mid_p - mid_dim),))
        w2 = jnp.pad(w2, ((0, mid_p - mid_dim), (0, emb_p - emb_dim)))
        b2 = jnp.pad(b2, ((0, emb_p - emb_dim),))

    # --- dtypes: bf16 MXU inputs, f32 accumulation / biases / output ---
    x2d = x2d.astype(compute_dtype)
    w1c = w1.astype(compute_dtype)
    w2c = w2.astype(compute_dtype)
    b1_2d = b1.reshape(1, mid_p).astype(jnp.float32)
    b2_2d = b2.reshape(1, emb_p).astype(jnp.float32)

    grid = (rows_p // tm_eff, mid_p // tk_eff)

    tile_bytes = _tile_vmem_bytes(tm_eff, tk_eff, emb_p, cbytes)
    vmem_limit = max(32 << 20, int(tile_bytes * 1.3) + (4 << 20))
    vmem_limit = min(vmem_limit, int(vmem_cap * 0.92))

    out2d = pl.pallas_call(
        ffn_kernel,
        out_shape=jax.ShapeDtypeStruct((rows_p, emb_p), jnp.float32),
        grid_spec=pltpu.PrefetchScalarGridSpec(
            num_scalar_prefetch=0,
            grid=grid,
            in_specs=[
                pl.BlockSpec((tm_eff, emb_p), lambda i, k: (i, 0)),    # x row tile
                pl.BlockSpec((emb_p, tk_eff), lambda i, k: (0, k)),    # w1 K-chunk
                pl.BlockSpec((1, tk_eff), lambda i, k: (0, k)),        # b1 K-chunk
                pl.BlockSpec((tk_eff, emb_p), lambda i, k: (k, 0)),    # w2 K-chunk
                pl.BlockSpec((1, emb_p), lambda i, k: (0, 0)),         # b2
            ],
            out_specs=pl.BlockSpec((tm_eff, emb_p), lambda i, k: (i, 0)),
        ),
        compiler_params=pltpu.CompilerParams(
            dimension_semantics=("parallel", "arbitrary"),
            vmem_limit_bytes=vmem_limit,
        ),
    )(x2d, w1c, b1_2d, w2c, b2_2d)

    # TODO(synk): for emb_dim >= 8192 on v7x, add an output-N grid axis (tm, tn) tiling
    # so full-emb output tiles are not required to fit in 64 MiB VMEM.
    return out2d[:rows, :emb_dim].reshape(batch, seq, emb_dim).astype(out_dtype)


if __name__ == "__main__":
    # Small shapes consistent with the module: batch=2, seq=8, emb_dim=32, mid_dim=64.
    batch, seq, emb_dim, mid_dim = 2, 8, 32, 64

    key = jax.random.PRNGKey(0)
    kx, kw1, kb1, kw2, kb2 = jax.random.split(key, 5)

    x = jax.random.normal(kx, (batch, seq, emb_dim), dtype=jnp.float32)
    # Deterministic parameter init (uniform, roughly matching nn.Linear scale).
    w1 = jax.random.uniform(kw1, (emb_dim, mid_dim), jnp.float32,
                            -1.0 / emb_dim ** 0.5, 1.0 / emb_dim ** 0.5)
    b1 = jax.random.uniform(kb1, (mid_dim,), jnp.float32,
                            -1.0 / emb_dim ** 0.5, 1.0 / emb_dim ** 0.5)
    w2 = jax.random.uniform(kw2, (mid_dim, emb_dim), jnp.float32,
                            -1.0 / mid_dim ** 0.5, 1.0 / mid_dim ** 0.5)
    b2 = jax.random.uniform(kb2, (emb_dim,), jnp.float32,
                            -1.0 / mid_dim ** 0.5, 1.0 / mid_dim ** 0.5)

    out = feed_forward(x, w1, b1, w2, b2)
    out = jax.block_until_ready(out)

    # Reference in plain f32 JAX (kernel uses bf16 MXU inputs + f32 accumulation,
    # so allow bf16-level tolerance).
    ref = jnp.maximum(x.reshape(-1, emb_dim) @ w1 + b1, 0.0) @ w2 + b2
    ref = ref.reshape(batch, seq, emb_dim)
    assert out.shape == (batch, seq, emb_dim)
    assert jnp.allclose(out, ref, atol=5e-2, rtol=5e-2), (
        float(jnp.max(jnp.abs(out - ref))))

    print("KERNEL_OK")
</pallas_src>

<mosaic_0001>
module attributes {stable_mosaic.version = 11 : i64} {
  func.func @ffn_kernel(%arg0: i32, %arg1: i32, %arg2: memref<16x128xbf16, #tpu.memory_space<vmem>>, %arg3: memref<128x256xbf16, #tpu.memory_space<vmem>>, %arg4: memref<1x256xf32, #tpu.memory_space<vmem>>, %arg5: memref<256x128xbf16, #tpu.memory_space<vmem>>, %arg6: memref<1x128xf32, #tpu.memory_space<vmem>>, %arg7: memref<16x128xf32, #tpu.memory_space<vmem>>) attributes {dimension_semantics = [#tpu.dimension_semantics<parallel>, #tpu.dimension_semantics<arbitrary>], iteration_bounds = array<i64: 1, 1>, scalar_prefetch = 0 : i64, scratch_operands = 0 : i64, tpu.core_type = #tpu.core_type<tc>, window_params = [{transform_indices = @transform_0, window_bounds = array<i64: 16, 128>}, {transform_indices = @transform_1, window_bounds = array<i64: 128, 256>}, {transform_indices = @transform_2, window_bounds = array<i64: 1, 256>}, {transform_indices = @transform_3, window_bounds = array<i64: 256, 128>}, {pipeline_mode = #tpu.pipeline_mode<synchronous>, transform_indices = @transform_4, window_bounds = array<i64: 1, 128>}, {transform_indices = @transform_5, window_bounds = array<i64: 16, 128>}]} {
    %c0 = arith.constant 0 : index
    %c0_0 = arith.constant 0 : index
    %0 = vector.load %arg2[%c0, %c0_0] : memref<16x128xbf16, #tpu.memory_space<vmem>>, vector<16x128xbf16>
    %c0_1 = arith.constant 0 : index
    %c0_2 = arith.constant 0 : index
    %1 = vector.load %arg3[%c0_1, %c0_2] : memref<128x256xbf16, #tpu.memory_space<vmem>>, vector<128x256xbf16>
    %cst = arith.constant dense<0.000000e+00> : vector<16x256xf32>
    %2 = tpu.matmul %0, %1, %cst {dimension_numbers = #tpu.dot_dimension_numbers<[1], [0], [0], [1], [0, 0, 1, 1], [], []>} : vector<16x128xbf16>, vector<128x256xbf16>, vector<16x256xf32> -> vector<16x256xf32>
    %c0_3 = arith.constant 0 : index
    %c0_4 = arith.constant 0 : index
    %3 = vector.load %arg4[%c0_3, %c0_4] : memref<1x256xf32, #tpu.memory_space<vmem>>, vector<1x256xf32>
    %4 = vector.broadcast %3 : vector<1x256xf32> to vector<16x256xf32>
    %5 = arith.addf %2, %4 : vector<16x256xf32>
    %cst_5 = arith.constant 0.000000e+00 : f32
    %6 = vector.broadcast %cst_5 : f32 to vector<16x256xf32>
    %7 = arith.maximumf %5, %6 : vector<16x256xf32>
    %8 = arith.truncf %7 : vector<16x256xf32> to vector<16x256xbf16>
    %c0_6 = arith.constant 0 : index
    %c0_7 = arith.constant 0 : index
    %9 = vector.load %arg5[%c0_6, %c0_7] : memref<256x128xbf16, #tpu.memory_space<vmem>>, vector<256x128xbf16>
    %cst_8 = arith.constant dense<0.000000e+00> : vector<16x128xf32>
    %10 = tpu.matmul %8, %9, %cst_8 {dimension_numbers = #tpu.dot_dimension_numbers<[1], [0], [0], [1], [0, 0, 1, 1], [], []>} : vector<16x256xbf16>, vector<256x128xbf16>, vector<16x128xf32> -> vector<16x128xf32>
    %c0_i32 = arith.constant 0 : i32
    %11 = arith.cmpi eq, %arg1, %c0_i32 : i32
    %12 = arith.extui %11 : i1 to i32
    %c0_i32_9 = arith.constant 0 : i32
    %13 = arith.cmpi ne, %12, %c0_i32_9 : i32
    scf.if %13 {
      %c0_12 = arith.constant 0 : index
      %c0_13 = arith.constant 0 : index
      %17 = vector.load %arg6[%c0_12, %c0_13] : memref<1x128xf32, #tpu.memory_space<vmem>>, vector<1x128xf32>
      %18 = vector.broadcast %17 : vector<1x128xf32> to vector<16x128xf32>
      %19 = arith.addf %10, %18 : vector<16x128xf32>
      %c0_14 = arith.constant 0 : index
      %c0_15 = arith.constant 0 : index
      %20 = vector.load %arg7[%c0_14, %c0_15] : memref<16x128xf32, #tpu.memory_space<vmem>>, vector<16x128xf32>
      tpu.vector_store %arg7[%c0_14, %c0_15], %19 {strides = array<i32>} : memref<16x128xf32, #tpu.memory_space<vmem>>, vector<16x128xf32>,
    } else {
    }
    %c0_i32_10 = arith.constant 0 : i32
    %14 = arith.cmpi sgt, %arg1, %c0_i32_10 : i32
    %15 = arith.extui %14 : i1 to i32
    %c0_i32_11 = arith.constant 0 : i32
    %16 = arith.cmpi ne, %15, %c0_i32_11 : i32
    scf.if %16 {
      %c0_12 = arith.constant 0 : index
      %c0_13 = arith.constant 0 : index
      %17 = vector.load %arg7[%c0_12, %c0_13] : memref<16x128xf32, #tpu.memory_space<vmem>>, vector<16x128xf32>
      %18 = arith.addf %17, %10 : vector<16x128xf32>
      %c0_14 = arith.constant 0 : index
      %c0_15 = arith.constant 0 : index
      %19 = vector.load %arg7[%c0_14, %c0_15] : memref<16x128xf32, #tpu.memory_space<vmem>>, vector<16x128xf32>
      tpu.vector_store %arg7[%c0_14, %c0_15], %18 {strides = array<i32>} : memref<16x128xf32, #tpu.memory_space<vmem>>, vector<16x128xf32>,
    } else {
    }
    return
  }
  func.func @transform_0(%arg0: i32, %arg1: i32) -> (i32, i32) {
    %c0_i32 = arith.constant 0 : i32
    %c0_i32_0 = arith.constant 0 : i32
    return %arg0, %c0_i32 : i32, i32
  }
  func.func @transform_1(%arg0: i32, %arg1: i32) -> (i32, i32) {
    %c0_i32 = arith.constant 0 : i32
    %c0_i32_0 = arith.constant 0 : i32
    return %c0_i32, %arg1 : i32, i32
  }
  func.func @transform_2(%arg0: i32, %arg1: i32) -> (i32, i32) {
    %c0_i32 = arith.constant 0 : i32
    %c0_i32_0 = arith.constant 0 : i32
    return %c0_i32, %arg1 : i32, i32
  }
  func.func @transform_3(%arg0: i32, %arg1: i32) -> (i32, i32) {
    %c0_i32 = arith.constant 0 : i32
    %c0_i32_0 = arith.constant 0 : i32
    return %arg1, %c0_i32 : i32, i32
  }
  func.func @transform_4(%arg0: i32, %arg1: i32) -> (i32, i32) {
    %c0_i32 = arith.constant 0 : i32
    %c0_i32_0 = arith.constant 0 : i32
    %c0_i32_1 = arith.constant 0 : i32
    return %c0_i32, %c0_i32_0 : i32, i32
  }
  func.func @transform_5(%arg0: i32, %arg1: i32) -> (i32, i32) {
    %c0_i32 = arith.constant 0 : i32
    %c0_i32_0 = arith.constant 0 : i32
    return %arg0, %c0_i32 : i32, i32
  }
}

</mosaic_0001>

<bundles_post_ra>
// kernel: tpu_custom_call.1
= control target key start
LH: loop header
LB: loop body
LE: loop exit
PB: predicated region body
PF: predicated region fallthrough
CT: control target
= control target key end

     0   :  { %10 = vsyncpa [#allocation3], 0  ;;  %s791_s0 = inlined_call_operand.hbm [shape: bf16[16,128], index: 0, kind: input, shape index: {}]   ;;  %s792_s1 = inlined_call_operand.hbm [shape: bf16[128,256], index: 1, kind: input, shape index: {}]   ;;  %s793_s2 = inlined_call_operand.hbm [shape: f32[1,256], index: 2, kind: input, shape index: {}]   ;;  %s794_s3 = inlined_call_operand.hbm [shape: bf16[256,128], index: 3, kind: input, shape index: {}]   ;;  %s795_s4 = inlined_call_operand.vmem [shape: f32[1,128], index: 4, kind: input, shape index: {}]   ;;  %s796_s5 = inlined_call_operand.hbm [shape: f32[16,128], index: 5, kind: output, shape index: {}]  }
   0x1   :  { %11 = vsyncpa [#allocation6], 0 }
   0x2   :  { %12 = vsyncpa [#allocation9], 0  ;;  %s31_s20 = sshll.u32 %s792_s1, 4  ;;  %s32_s20 = int_to_ptr.hbm [resolvable:$true] %s31_s20 }
   0x3   :  { %13 = vsyncpa [#allocation4], 0  ;;  %s728_s21 = smov [#allocation5]   ;;  %s18_s25 = sshll.u32 %s791_s0, 4  ;;  %s19_s25 = int_to_ptr.hbm [resolvable:$true] %s18_s25 }
   0x4   :  { %s33_s22 = sshll.u32 %s728_s21, 4  ;;  %s729_s26 = smov 128   ;;  %s34_s22 = int_to_ptr.vmem [resolvable:$true] %s33_s22 }
   0x5   :  { %s730_s27 = smov 8   ;;  %s731_s28 = smov [#allocation2]  }
   0x6   :  { %39 = dma.hbm_to_vmem [thread:$0]  %s32_s20, 2048, %s34_s22, [#allocation6], %s729_s26, %s729_s26, %s730_s27  }
   0x7   :  { %s20_s29 = sshll.u32 %s731_s28, 4  ;;  %s732_s1 = smov 64   ;;  %s21_s29 = int_to_ptr.vmem [resolvable:$true] %s20_s29 }
   0x8   :  { %s733_s30 = smov 4   ;;  %s45_s8 = sshll.u32 %s793_s2, 4  ;;  %s46_s8 = int_to_ptr.hbm [resolvable:$true] %s45_s8 }
   0x9   :  { %26 = dma.hbm_to_vmem [thread:$0]  %s19_s25, 128, %s21_s29, [#allocation3], %s732_s1, %s732_s1, %s733_s30  }
   0xa   :  { %s734_s9 = smov [#allocation7]   ;;  %s55_s12 = sshll.u32 %s794_s3, 4  ;;  %s56_s12 = int_to_ptr.hbm [resolvable:$true] %s55_s12 }
   0xb   :  { %s47_s0 = sshll.u32 %s734_s9, 4  ;;  %s735_s13 = smov [#allocation8]   ;;  %s48_s0 = int_to_ptr.vmem [resolvable:$true] %s47_s0 }
   0xc   :  { %50 = dma.hbm_to_vmem [thread:$0]  %s46_s8, 32, %s48_s0, [#allocation6]  }
   0xd   :  { %s57_s14 = sshll.u32 %s735_s13, 4  ;;  %s58_s14 = int_to_ptr.vmem [resolvable:$true] %s57_s14 }
   0xe   :  { %63 = dma.hbm_to_vmem [thread:$0]  %s56_s12, 2048, %s58_s14, [#allocation9], %s732_s1, %s732_s1, %s733_s30  }
   0xf   :  { %720 = dma.done.wait [#allocation3], 128  }
  0x10   :  { %721 = vsyncadd [#allocation3], 4294967168 }
  0x11   :  { %722 = dma.done.wait [#allocation6], 2080  }
  0x12   :  { %723 = vsyncadd [#allocation6], 4294965216 }
  0x13   :  { %724 = dma.done.wait [#allocation9], 2048  }
  0x14   :  { %725 = vsyncadd [#allocation9], 4294965248  ;;  %v487_v0 = vld [vmem:[#allocation5 + $0x70] sm:$0xf]  ;;  %v573_v1 = vld [vmem:[#allocation5 + $0x74] sm:$0xf0] }
  0x15   :  { %v572_v2 = vld [vmem:[#allocation5 + $0x74] sm:$0xf]  ;;  %v488_v3 = vor.u32 %v573_v1, %v487_v0  ;;  %v489_v4 = vld [vmem:[#allocation5 + $0x78] sm:$0xf0]  ;;  %v479_v5 = vld [vmem:[#allocation5 + $0x60] sm:$0xf] }
  0x16   :  { %v571_v6 = vld [vmem:[#allocation5 + $0x64] sm:$0xf0]  ;;  %v492_v7 = vor.u32 %v572_v2, %v489_v4  ;;  %v570_v8 = vld [vmem:[#allocation5 + $0x64] sm:$0xf]  ;;  %v481_v9 = vld [vmem:[#allocation5 + $0x68] sm:$0xf0] }
  0x17   :  { %192 = vmatpush.bf16.msra.mxu0 %v488_v3  ;;  %v480_v10 = vor.u32 %v571_v6, %v479_v5  ;;  %v484_v11 = vor.u32 %v570_v8, %v481_v9  ;;  %v471_v12 = vld [vmem:[#allocation5 + $0x50] sm:$0xf]  ;;  %v569_v13 = vld [vmem:[#allocation5 + $0x54] sm:$0xf0]  ;;  %v568_v14 = vld [vmem:[#allocation5 + $0x54] sm:$0xf] }
  0x18   :  { %206 = vmatpush.bf16.msra.mxu1 %v492_v7  ;;  %v473_v15 = vld [vmem:[#allocation5 + $0x58] sm:$0xf0]  ;;  %v472_v16 = vor.u32 %v569_v13, %v471_v12  ;;  %v463_v18 = vld [vmem:[#allocation5 + $0x40] sm:$0xf]  ;;  %v567_v19 = vld [vmem:[#allocation5 + $0x44] sm:$0xf0] }
  0x19   :  { %v476_v17 = vor.u32 %v568_v14, %v473_v15  ;;  %v566_v20 = vld [vmem:[#allocation5 + $0x44] sm:$0xf]  ;;  %v465_v21 = vld [vmem:[#allocation5 + $0x48] sm:$0xf0]  ;;  %v464_v22 = vor.u32 %v567_v19, %v463_v18  ;;  %v581_v23 = vld [vmem:[#allocation8 + $0x38] sm:$0xff]  ;;  %s736_s15 = smov [#allocation10]  }
  0x1a   :  { %v589_v24 = vld [vmem:[#allocation8 + $0x78] sm:$0xff]  ;;  %v468_v25 = vor.u32 %v566_v20, %v465_v21  ;;  %v455_v26 = vld [vmem:[#allocation5 + $0x30] sm:$0xf]  ;;  %v564_v28 = vld [vmem:[#allocation5 + $0x34] sm:$0xf]  ;;  %354 = vmatpush.bf16.msra.mxu2 %v581_v23  ;;  %s408_s16 = sshll.u32 %s736_s15, 4  ;;  %s409_s16 = int_to_ptr.vmem [resolvable:$true] %s408_s16 }
  0x1b   :  { %193 = vmatpush.bf16.msra.mxu0 %v480_v10  ;;  %v565_v27 = vld [vmem:[#allocation5 + $0x34] sm:$0xf0]  ;;  %v457_v29 = vld [vmem:[#allocation5 + $0x38] sm:$0xf0]  ;;  %368 = vmatpush.bf16.msra.mxu3 %v589_v24  ;;  %v447_v34 = vld [vmem:[#allocation5 + $0x20] sm:$0xf] }
  0x1c   :  { %207 = vmatpush.bf16.msra.mxu1 %v484_v11  ;;  %v580_v30 = vld [vmem:[#allocation8 + $0x30] sm:$0xff]  ;;  %v456_v32 = vor.u32 %v565_v27, %v455_v26  ;;  %v460_v33 = vor.u32 %v564_v28, %v457_v29  ;;  %v563_v35 = vld [vmem:[#allocation5 + $0x24] sm:$0xf0]  ;;  %v562_v36 = vld [vmem:[#allocation5 + $0x24] sm:$0xf]  ;;  %s410_s19 = sshll.u32 %s796_s5, 4  ;;  %s411_s19 = int_to_ptr.hbm [resolvable:$true] %s410_s19 }
  0x1d   :  { %v588_v31 = vld [vmem:[#allocation8 + $0x70] sm:$0xff]  ;;  %v449_v37 = vld [vmem:[#allocation5 + $0x28] sm:$0xf0]  ;;  %v448_v40 = vor.u32 %v563_v35, %v447_v34  ;;  %v441_v45 = vld [vmem:[#allocation5 + $0x18] sm:$0xf0] }
  0x1e   :  { %355 = vmatpush.bf16.msra.mxu2 %v580_v30  ;;  %v579_v38 = vld [vmem:[#allocation8 + $0x28] sm:$0xff]  ;;  %v452_v41 = vor.u32 %v562_v36, %v449_v37  ;;  %v561_v43 = vld [vmem:[#allocation5 + $0x14] sm:$0xf0]  ;;  %v560_v44 = vld [vmem:[#allocation5 + $0x14] sm:$0xf] }
  0x1f   :  { %194 = vmatpush.bf16.msra.mxu0 %v472_v16  ;;  %369 = vmatpush.bf16.msra.mxu3 %v588_v31  ;;  %v587_v39 = vld [vmem:[#allocation8 + $0x68] sm:$0xff]  ;;  %v578_v46 = vld [vmem:[#allocation8 + $0x20] sm:$0xff]  ;;  %v444_v49 = vor.u32 %v560_v44, %v441_v45  ;;  %v557_v56 = vld [vmem:[#allocation2] sm:$0xff] }
  0x20   :  { %208 = vmatpush.bf16.msra.mxu1 %v476_v17  ;;  %v439_v42 = vld [vmem:[#allocation5 + $0x10] sm:$0xf]  ;;  %v586_v47 = vld [vmem:[#allocation8 + $0x60] sm:$0xff]  ;;  %v433_v53 = vld [vmem:[#allocation5 + $0x8] sm:$0xf0] }
  0x21   :  { %v440_v48 = vor.u32 %v561_v43, %v439_v42  ;;  %v431_v50 = vld [vmem:[#allocation5] sm:$0xf]  ;;  %v559_v51 = vld [vmem:[#allocation5 + $0x4] sm:$0xf0]  ;;  %v558_v52 = vld [vmem:[#allocation5 + $0x4] sm:$0xf] }
  0x22   :  { %356 = vmatpush.bf16.msra.mxu2 %v579_v38  ;;  %v432_v54 = vor.u32 %v559_v51, %v431_v50  ;;  %v436_v55 = vor.u32 %v558_v52, %v433_v53  ;;  %v577_v57 = vld [vmem:[#allocation8 + $0x18] sm:$0xff]  ;;  %v576_v59 = vld [vmem:[#allocation8 + $0x10] sm:$0xff]  ;;  %v575_v61 = vld [vmem:[#allocation8 + $0x8] sm:$0xff] }
  0x23   :  { %195 = vmatpush.bf16.msra.mxu0 %v464_v22  ;;  %370 = vmatpush.bf16.msra.mxu3 %v587_v39  ;;  %v585_v58 = vld [vmem:[#allocation8 + $0x58] sm:$0xff]  ;;  %v584_v60 = vld [vmem:[#allocation8 + $0x50] sm:$0xff]  ;;  %v583_v62 = vld [vmem:[#allocation8 + $0x48] sm:$0xff] }
  0x24   :  { %209 = vmatpush.bf16.msra.mxu1 %v468_v25  ;;  %v574_v63 = vld [vmem:[#allocation8] sm:$0xff]  ;;  %v100_v1 = vld [vmem:[#allocation7] sm:$0x3]  ;;  %v599_v19 = vld [vmem:[%s795_s4] ss:$0 sm:$0xff] }
  0x25   :  { %v582_v0 = vld [vmem:[#allocation8 + $0x40] sm:$0xff]  ;;  %v102_v4 = vperm.slane %v100_v1, 0  ;;  %v103_v5 = vperm.slane %v100_v1, 1 }
  0x26   :  { %357 = vmatpush.bf16.msra.mxu2 %v578_v46 }
  0x27   :  { %196 = vmatpush.bf16.msra.mxu0 %v456_v32  ;;  %371 = vmatpush.bf16.msra.mxu3 %v586_v47 }
  0x28   :  { %210 = vmatpush.bf16.msra.mxu1 %v460_v33 }
  0x2a   :  { %358 = vmatpush.bf16.msra.mxu2 %v577_v57 }
  0x2b   :  { %197 = vmatpush.bf16.msra.mxu0 %v448_v40  ;;  %372 = vmatpush.bf16.msra.mxu3 %v585_v58 }
  0x2c   :  { %211 = vmatpush.bf16.msra.mxu1 %v452_v41 }
  0x2e   :  { %359 = vmatpush.bf16.msra.mxu2 %v576_v59 }
  0x2f   :  { %198 = vmatpush.bf16.msra.mxu0 %v440_v48  ;;  %373 = vmatpush.bf16.msra.mxu3 %v584_v60 }
  0x30   :  { %212 = vmatpush.bf16.msra.mxu1 %v444_v49 }
  0x32   :  { %360 = vmatpush.bf16.msra.mxu2 %v575_v61 }
  0x33   :  { %199 = vmatpush.bf16.msra.mxu0 %v432_v54  ;;  %374 = vmatpush.bf16.msra.mxu3 %v583_v62 }
  0x34   :  { %213 = vmatpush.bf16.msra.mxu1 %v436_v55 }
  0x36   :  { %200 = vmatmul.bf16.vlgmr.msra.gmra.mxu0 %v557_v56  ;;  %361 = vmatpush.bf16.msra.mxu2 %v574_v63 }
  0x37   :  { %214 = vmatmul.bf16.vlgmr.msra.gmra.mxu1 %v557_v56  ;;  %375 = vmatpush.bf16.msra.mxu3 %v582_v0 }
  0xb3   :  { %v201_v2 = vpop.f32.mrf.mxu0 }
  0xb4   :  { %v215_v3 = vpop.f32.mrf.mxu1  ;;  %v202_v6 = vadd.f32 %v201_v2, %v102_v4 }
  0xb5   :  { %v216_v7 = vadd.f32 %v215_v3, %v103_v5 }
  0xb6   :  { %v220_v12 = vmax.f32 %v202_v6, 0.0 }
  0xb7   :  { %v221_v14 = vmax.f32 %v216_v7, 0.0 }
  0xbb   :  { %v203_v8 = vpop.f32.mrf.mxu0 }
  0xbc   :  { %v204_v9 = vadd.f32 %v203_v8, %v102_v4  ;;  %v217_v10 = vpop.f32.mrf.mxu1 }
  0xbd   :  { %v218_v11 = vadd.f32 %v217_v10, %v103_v5 }
  0xbe   :  { %v222_v13 = vmax.f32 %v204_v9, 0.0 }
  0xbf   :  { %v223_v15 = vmax.f32 %v218_v11, 0.0 }
  0xc0   :  { %v224_v16 = vpack.c.bf16 %v222_v13, %v220_v12 }
  0xc1   :  { %v225_v17 = vpack.c.bf16 %v223_v15, %v221_v14 }
  0xc2   :  { %362 = vmatmul.bf16.vlgmr.msra.gmra.mxu2 %v224_v16 }
  0xc3   :  { %376 = vmatmul.bf16.vlgmr.msra.gmra.mxu3 %v225_v17 }
 0x145   :  { %v363_v18 = vpop.f32.mrf.mxu2 }
 0x146   :  { %v377_v20 = vpop.f32.mrf.mxu3 }
 0x147   :  { %v378_v21 = vadd.f32 %v377_v20, %v363_v18 }
 0x149   :  { %v390_v22 = vadd.f32 %v599_v19, %v378_v21 }
 0x14b   :  { %392 = vst [vmem:[#allocation10] sm:$0xff] %v390_v22 }
 0x14d   :  { %v365_v23 = vpop.f32.mrf.mxu2 }
 0x14e   :  { %v379_v24 = vpop.f32.mrf.mxu3 }
 0x14f   :  { %v380_v25 = vadd.f32 %v379_v24, %v365_v23 }
 0x151   :  { %v391_v26 = vadd.f32 %v599_v19, %v380_v25 }
 0x153   :  { %393 = vst [vmem:[#allocation10 + $0x8] sm:$0xff] %v391_v26 }
 0x154   :  { %416 = dma.vmem_to_hbm [thread:$0]  %s409_s16, 256, %s411_s19, [#allocation4], %s729_s26, %s729_s26, %s730_s27  }
 0x155   :  { %726 = dma.done.wait [#allocation4], 256  }
 0x156   :  { %727 = vsyncadd [#allocation4], 4294967040 }
 0x157   :  { %421 = vsyncpa [#allocation3], 1 }
 0x158   :  { %422 = vsyncpa [#allocation6], 1 }
 0x159   :  { %423 = vsyncpa [#allocation9], 1 }
 0x15a   :  { %424 = vsyncpa [#allocation4], 1 }

</bundles_post_ra>
